<compile_context>
chip_gen: v7x
topology: tpu7x:2x2x1
jax: 0.10.0
libtpu: 0.0.40
codegen_flags: <defaults>
</compile_context>

<pallas_src>
import numpy as np
import jax
import jax.numpy as jnp
from jax import lax
from jax.experimental import pallas as pl
from jax.experimental.pallas import tpu as pltpu


def _round_up(x, m):
    return ((x + m - 1) // m) * m


def _pick_tile(size, cap, align):
    """Largest tile <= cap (multiple of `align`) that minimizes padding of `size`."""
    nblk = -(-size // cap)
    tile = _round_up(-(-size // nblk), align)
    return tile, tile * nblk


# Generation-safe tile caps (see header comment).
MAX_DIFF_TM = 512       # rows per diff output tile
MAX_DIFF_TN = 2048      # lanes per diff output tile (>=1024 amortizes grid overhead)
MAX_ATTR_TILE = 32768   # lanes per edge-attr output tile (~1 MiB f32)


# ---------------------------------------------------------------------------
# Kernel 1 (stage 1): per-node 4-vectors.
#   d_c  = rowsum((x @ (Wq_c @ Wk_c^T)) * x)   (diag of einsum('mhi,nhi'))
#   vs_c = x @ sum_h Wv_c[h]                   (sum_h V[:, h, c])
#   LayerNorm(2) simplified: half=(d0-d1)/2, var=half^2.
# Emits A = [dn1, vs1, -dn0, -vs0] and B = [vs1, dn1, vs0, dn0].
# ---------------------------------------------------------------------------
def node_vec_kernel(ln_ref, x_ref, m0_ref, m1_ref, wv_ref, a_ref, b_ref):
    f32 = jnp.float32
    x = x_ref[...]                                              # (n, feat)
    # Three separate dots (instead of one fused + sliced matmul) so no output
    # column slice ever crosses a 128-lane boundary, whatever `feat` is.
    y0 = jnp.dot(x, m0_ref[...], preferred_element_type=f32)    # (n, feat)
    y1 = jnp.dot(x, m1_ref[...], preferred_element_type=f32)    # (n, feat)
    vs = jnp.dot(x, wv_ref[...], preferred_element_type=f32)    # (n, 2)

    d0 = jnp.sum(y0 * x, axis=-1, keepdims=True)                # (n, 1)
    d1 = jnp.sum(y1 * x, axis=-1, keepdims=True)                # (n, 1)
    vs0 = vs[:, 0:1]
    vs1 = vs[:, 1:2]

    # LayerNorm over the size-2 channel axis (eps = 1e-5), simplified algebra.
    half = 0.5 * (d0 - d1)
    inv = lax.rsqrt(half * half + 1e-5)
    g0, g1, b0, b1 = ln_ref[0], ln_ref[1], ln_ref[2], ln_ref[3]
    dn0 = half * inv * g0 + b0
    dn1 = (-half) * inv * g1 + b1

    a_ref[...] = jnp.concatenate([dn1, vs1, -dn0, -vs0], axis=1)   # (n, 4)
    b_ref[...] = jnp.concatenate([vs1, dn1, vs0, dn0], axis=1)     # (n, 4)


# ---------------------------------------------------------------------------
# Kernel 2 (stage 2): diff[m, n] = score[m, n, 1] - score[m, n, 0] = (A @ B^T)
# tiled over the (n, n) output; B is already transposed to (4, n).
# ---------------------------------------------------------------------------
def diff_kernel(a_ref, bt_ref, diff_ref):
    diff_ref[...] = jnp.dot(a_ref[...], bt_ref[...],
                            preferred_element_type=jnp.float32)


# ---------------------------------------------------------------------------
# Kernel 3: edge-attribute linear, lane-dense transposed output.
#   attr_t[e, idx] = sum_r Wa[e, r] * rel_cm[r, idx] + ba[e]
# ---------------------------------------------------------------------------
def attr_kernel(wa_ref, ba_ref, rel_ref, attr_ref):
    attr_ref[...] = (
        jnp.dot(wa_ref[...], rel_ref[...], preferred_element_type=jnp.float32)
        + ba_ref[...])


# ---------------------------------------------------------------------------
# One-time weight folding (hoisted out of the per-call path).
# ---------------------------------------------------------------------------
def fuse_params(params):
    wq = jnp.asarray(params["wq"], jnp.float32)     # (2H, feat) torch layout
    wk = jnp.asarray(params["wk"], jnp.float32)
    wv = jnp.asarray(params["wv"], jnp.float32)
    # reshape(n, H, 2) puts the channel on the fastest axis -> even/odd rows.
    q0, q1 = wq[0::2], wq[1::2]                     # (H, feat) each
    k0, k1 = wk[0::2], wk[1::2]
    v0, v1 = wv[0::2], wv[1::2]
    m0 = q0.T @ k0                                  # (feat, feat)
    m1 = q1.T @ k1
    wv2 = jnp.stack([jnp.sum(v0, axis=0), jnp.sum(v1, axis=0)], axis=1)  # (feat, 2)
    ln = jnp.concatenate([jnp.asarray(params["ln_w"], jnp.float32),
                          jnp.asarray(params["ln_b"], jnp.float32)])     # (4,) SMEM
    wa = jnp.asarray(params["wa"], jnp.float32)     # (edge_dim, rel_dim)
    ba = jnp.asarray(params["ba"], jnp.float32)
    edge_dim, rel_dim = wa.shape
    e_pad = _round_up(edge_dim, 8)                  # full-sublane output vregs
    wa_pad = jnp.zeros((e_pad, rel_dim), jnp.float32).at[:edge_dim].set(wa)
    ba_pad = jnp.zeros((e_pad, 1), jnp.float32).at[:edge_dim, 0].set(ba)
    return {"m0": m0, "m1": m1, "wv2": wv2, "ln": ln,
            "wa_pad": wa_pad, "ba_pad": ba_pad, "edge_dim": int(edge_dim)}


# ---------------------------------------------------------------------------
# Device-side forward (jitted): returns (diff (n_pad, n_pad), attr_t (8, n2_pad)).
# ---------------------------------------------------------------------------
def _device_forward(bboxes, rel_cm, m0, m1, wv2, ln, wa_pad, ba_pad):
    x = jnp.asarray(bboxes, jnp.float32)
    while x.ndim > 2:                               # force_dim_reduce(bboxes, 2)
        x = x[0]
    n, _ = x.shape
    rel_cm = jnp.asarray(rel_cm, jnp.float32)       # (rel_dim, n, n) channel-major
    rel_dim = rel_cm.shape[0]
    e_pad = wa_pad.shape[0]

    vmem = pl.BlockSpec(memory_space=pltpu.MemorySpace.VMEM)
    smem = pl.BlockSpec(memory_space=pltpu.MemorySpace.SMEM)

    # ---- stage 1: per-node 4-vectors (O(n*feat), one small block) ----------
    a_vec, b_vec = pl.pallas_call(
        node_vec_kernel,
        out_shape=(jax.ShapeDtypeStruct((n, 4), jnp.float32),
                   jax.ShapeDtypeStruct((n, 4), jnp.float32)),
        in_specs=[smem, vmem, vmem, vmem, vmem],
        out_specs=(vmem, vmem),
    )(ln, x, m0, m1, wv2)

    # ---- stage 2: diff = A @ B^T, tiled over the (n, n) output -------------
    tm, n_pad_m = _pick_tile(n, MAX_DIFF_TM, 8)
    tn, n_pad_n = _pick_tile(n, MAX_DIFF_TN, 128)
    a_p = jnp.pad(a_vec, ((0, n_pad_m - n), (0, 0)))            # (n_pad_m, 4)
    bt = jnp.pad(b_vec, ((0, n_pad_n - n), (0, 0))).T           # (4, n_pad_n)
    diff = pl.pallas_call(
        diff_kernel,
        out_shape=jax.ShapeDtypeStruct((n_pad_m, n_pad_n), jnp.float32),
        grid=(n_pad_m // tm, n_pad_n // tn),
        in_specs=[pl.BlockSpec((tm, 4), lambda i, j: (i, 0)),
                  pl.BlockSpec((4, tn), lambda i, j: (0, j))],
        out_specs=pl.BlockSpec((tm, tn), lambda i, j: (i, j)),
        compiler_params=pltpu.CompilerParams(
            dimension_semantics=("parallel", "parallel")),
    )(a_p, bt)

    # ---- edge-attr linear: lane-dense (e_pad, n^2) output, big tiles --------
    n2 = n * n
    rel_flat = rel_cm.reshape(rel_dim, n2)          # channel-major: no transpose
    tile, n2_pad = _pick_tile(n2, MAX_ATTR_TILE, 128)
    if n2_pad > n2:
        rel_flat = jnp.pad(rel_flat, ((0, 0), (0, n2_pad - n2)))
    attr_t = pl.pallas_call(
        attr_kernel,
        out_shape=jax.ShapeDtypeStruct((e_pad, n2_pad), jnp.float32),
        grid=(n2_pad // tile,),
        in_specs=[pl.BlockSpec((e_pad, rel_dim), lambda i: (0, 0)),
                  pl.BlockSpec((e_pad, 1), lambda i: (0, 0)),
                  pl.BlockSpec((rel_dim, tile), lambda i: (0, i))],
        out_specs=pl.BlockSpec((e_pad, tile), lambda i: (0, i)),
        compiler_params=pltpu.CompilerParams(
            dimension_semantics=("parallel",)),
    )(wa_pad, ba_pad, rel_flat)

    return diff, attr_t


_device_forward_jit = jax.jit(_device_forward)


# ---------------------------------------------------------------------------
# Full forward (host glue for the data-dependent edge extraction).
# ---------------------------------------------------------------------------
def spatial_graph_builder(bboxes, rel, fused, edge_limit, *, rel_channel_major=True):
    if not rel_channel_major:
        # TODO(synk): this one-time layout fix costs an extra HBM pass over rel;
        # produce rel channel-major (rel_dim, n, n) upstream to avoid it.
        rel = jnp.moveaxis(jnp.asarray(rel, jnp.float32), -1, 0)
    diff, attr_t = jax.block_until_ready(_device_forward_jit(
        bboxes, rel, fused["m0"], fused["m1"], fused["wv2"], fused["ln"],
        fused["wa_pad"], fused["ba_pad"]))
    # Single consolidated host transfer of both dense results.
    diff_np, attr_t_np = jax.device_get((diff, attr_t))

    shp = tuple(np.shape(bboxes))
    while len(shp) > 2:                             # force_dim_reduce(bboxes, 2)
        shp = shp[1:]
    n = shp[0]
    edge_dim = fused["edge_dim"]
    diff_np = diff_np[:n, :n]                       # drop tile padding

    # argmax over the size-2 channel axis; ties resolve to index 0 (torch rule).
    adj = diff_np > 0.0
    # TODO(synk): torch.where yields a data-dependent edge count; there is no
    # static-shape Pallas equivalent, so the gather / top-k glue stays host-side.
    # (For E << n^2 one could skip the dense attr kernel and compute edge_attr
    # sparsely from rel[:, i, j] here instead.)
    i, j = np.nonzero(adj)                          # row-major == torch.where order
    edge_index = np.stack([i, j], axis=0)           # (2, E)
    edge_weights = diff_np[i, j]                    # (E,)
    edge_attr = attr_t_np[:edge_dim, i * n + j].T   # (E, edge_dim)

    # Faithful to the reference: compares against edge_index.shape[0] (== 2).
    if edge_limit < edge_index.shape[0]:
        limit_index = np.argsort(-edge_weights, kind="stable")[:edge_limit]
        edge_index = edge_index[:, limit_index]
        edge_weights = edge_weights[limit_index]
        edge_attr = edge_attr[limit_index, :]
    return edge_index, edge_weights, edge_attr


if __name__ == "__main__":
    n, feat, d_hidden, rel_dim, edge_dim = 8, 4, 8, 6, 3
    key = jax.random.PRNGKey(0)
    ks = jax.random.split(key, 7)

    bboxes = jax.random.uniform(ks[0], (1, n, feat), dtype=jnp.float32)  # force_dim_reduce
    # rel is produced channel-major (rel_dim, n, n) so the attr kernel reads it
    # directly (no device-side transpose pass).
    rel_cm = jax.random.normal(ks[1], (rel_dim, n, n), dtype=jnp.float32)

    params = {
        "wq": 0.1 * jax.random.normal(ks[2], (2 * d_hidden, feat), dtype=jnp.float32),
        "wk": 0.1 * jax.random.normal(ks[3], (2 * d_hidden, feat), dtype=jnp.float32),
        "wv": 0.1 * jax.random.normal(ks[4], (2 * d_hidden, feat), dtype=jnp.float32),
        "ln_w": jnp.ones((2,), jnp.float32),        # LayerNorm affine init
        "ln_b": jnp.zeros((2,), jnp.float32),
        "wa": 0.1 * jax.random.normal(ks[5], (edge_dim, rel_dim), dtype=jnp.float32),
        "ba": 0.1 * jax.random.normal(ks[6], (edge_dim,), dtype=jnp.float32),
    }
    fused = fuse_params(params)                     # hoisted one-time weight algebra

    # --- run the kernels once and check the dense outputs vs a numpy reference
    diff_dev, attr_t_dev = jax.block_until_ready(_device_forward_jit(
        bboxes, rel_cm, fused["m0"], fused["m1"], fused["wv2"], fused["ln"],
        fused["wa_pad"], fused["ba_pad"]))
    diff_np = np.asarray(diff_dev)[:n, :n]
    attr_np = np.asarray(attr_t_dev)[:edge_dim, :n * n].T.reshape(n, n, edge_dim)

    x64 = np.asarray(bboxes, np.float64).reshape(n, feat)
    wq64 = np.asarray(params["wq"], np.float64)
    wk64 = np.asarray(params["wk"], np.float64)
    wv64 = np.asarray(params["wv"], np.float64)
    Q = (x64 @ wq64.T).reshape(n, d_hidden, 2)
    K = (x64 @ wk64.T).reshape(n, d_hidden, 2)
    V = (x64 @ wv64.T).reshape(n, d_hidden, 2)
    qk_diag = np.einsum("mhi,mhi->mi", Q, K)                        # (n, 2)
    mean = qk_diag.mean(-1, keepdims=True)
    var = qk_diag.var(-1, keepdims=True)
    dn = ((qk_diag - mean) / np.sqrt(var + 1e-5)
          * np.asarray(params["ln_w"], np.float64)
          + np.asarray(params["ln_b"], np.float64))
    VS = V.sum(1)                                                   # (n, 2)
    score = dn[:, None, :] * VS[None, :, :]
    score = score + score.transpose(1, 0, 2)
    diff_ref = score[..., 1] - score[..., 0]
    rel_nat = np.transpose(np.asarray(rel_cm, np.float64), (1, 2, 0))
    attr_ref = (rel_nat @ np.asarray(params["wa"], np.float64).T
                + np.asarray(params["ba"], np.float64))
    np.testing.assert_allclose(diff_np, diff_ref, rtol=5e-2, atol=5e-3)
    np.testing.assert_allclose(attr_np, attr_ref, rtol=5e-2, atol=5e-3)

    # --- full forward (edge extraction glue) + shape sanity checks -----------
    edge_index, edge_weights, edge_attr = spatial_graph_builder(
        bboxes, rel_cm, fused, edge_limit=16)
    assert edge_index.shape[0] == 2
    assert edge_weights.shape[0] == edge_index.shape[1]
    assert edge_attr.shape == (edge_index.shape[1], edge_dim)

    print("KERNEL_OK")
</pallas_src>

<mosaic_0001>
module attributes {stable_mosaic.version = 11 : i64} {
  func.func @node_vec_kernel(%arg0: memref<4xf32, #tpu.memory_space<smem>>, %arg1: memref<8x4xf32, #tpu.memory_space<vmem>>, %arg2: memref<4x4xf32, #tpu.memory_space<vmem>>, %arg3: memref<4x4xf32, #tpu.memory_space<vmem>>, %arg4: memref<4x2xf32, #tpu.memory_space<vmem>>, %arg5: memref<8x4xf32, #tpu.memory_space<vmem>>, %arg6: memref<8x4xf32, #tpu.memory_space<vmem>>) attributes {dimension_semantics = [], scalar_prefetch = 0 : i64, scratch_operands = 0 : i64, tpu.core_type = #tpu.core_type<tc>} {
    %c0 = arith.constant 0 : index
    %c0_0 = arith.constant 0 : index
    %0 = vector.load %arg1[%c0, %c0_0] : memref<8x4xf32, #tpu.memory_space<vmem>>, vector<8x4xf32>
    %c0_1 = arith.constant 0 : index
    %c0_2 = arith.constant 0 : index
    %1 = vector.load %arg2[%c0_1, %c0_2] : memref<4x4xf32, #tpu.memory_space<vmem>>, vector<4x4xf32>
    %cst = arith.constant dense<0.000000e+00> : vector<8x4xf32>
    %2 = tpu.matmul %0, %1, %cst {dimension_numbers = #tpu.dot_dimension_numbers<[1], [0], [0], [1], [0, 0, 1, 1], [], []>} : vector<8x4xf32>, vector<4x4xf32>, vector<8x4xf32> -> vector<8x4xf32>
    %c0_3 = arith.constant 0 : index
    %c0_4 = arith.constant 0 : index
    %3 = vector.load %arg3[%c0_3, %c0_4] : memref<4x4xf32, #tpu.memory_space<vmem>>, vector<4x4xf32>
    %cst_5 = arith.constant dense<0.000000e+00> : vector<8x4xf32>
    %4 = tpu.matmul %0, %3, %cst_5 {dimension_numbers = #tpu.dot_dimension_numbers<[1], [0], [0], [1], [0, 0, 1, 1], [], []>} : vector<8x4xf32>, vector<4x4xf32>, vector<8x4xf32> -> vector<8x4xf32>
    %c0_6 = arith.constant 0 : index
    %c0_7 = arith.constant 0 : index
    %5 = vector.load %arg4[%c0_6, %c0_7] : memref<4x2xf32, #tpu.memory_space<vmem>>, vector<4x2xf32>
    %cst_8 = arith.constant dense<0.000000e+00> : vector<8x2xf32>
    %6 = tpu.matmul %0, %5, %cst_8 {dimension_numbers = #tpu.dot_dimension_numbers<[1], [0], [0], [1], [0, 0, 1, 1], [], []>} : vector<8x4xf32>, vector<4x2xf32>, vector<8x2xf32> -> vector<8x2xf32>
    %7 = arith.mulf %2, %0 : vector<8x4xf32>
    %cst_9 = arith.constant dense<0.000000e+00> : vector<8xf32>
    %8 = vector.multi_reduction <add>, %7, %cst_9 [1] : vector<8x4xf32> to vector<8xf32>
    %9 = vector.shape_cast %8 : vector<8xf32> to vector<8x1xf32>
    %10 = arith.mulf %4, %0 : vector<8x4xf32>
    %cst_10 = arith.constant dense<0.000000e+00> : vector<8xf32>
    %11 = vector.multi_reduction <add>, %10, %cst_10 [1] : vector<8x4xf32> to vector<8xf32>
    %12 = vector.shape_cast %11 : vector<8xf32> to vector<8x1xf32>
    %13 = vector.extract_strided_slice %6 {offsets = [0, 0], sizes = [8, 1], strides = [1, 1]} : vector<8x2xf32> to vector<8x1xf32>
    %14 = vector.extract_strided_slice %6 {offsets = [0, 1], sizes = [8, 1], strides = [1, 1]} : vector<8x2xf32> to vector<8x1xf32>
    %15 = arith.subf %9, %12 : vector<8x1xf32>
    %cst_11 = arith.constant 5.000000e-01 : f32
    %16 = vector.broadcast %cst_11 : f32 to vector<8x1xf32>
    %17 = arith.mulf %16, %15 : vector<8x1xf32>
    %18 = arith.mulf %17, %17 : vector<8x1xf32>
    %cst_12 = arith.constant 9.99999974E-6 : f32
    %19 = vector.broadcast %cst_12 : f32 to vector<8x1xf32>
    %20 = arith.addf %18, %19 : vector<8x1xf32>
    %21 = math.rsqrt %20 : vector<8x1xf32>
    %c0_13 = arith.constant 0 : index
    %22 = memref.load %arg0[%c0_13] : memref<4xf32, #tpu.memory_space<smem>>
    %c1 = arith.constant 1 : index
    %23 = memref.load %arg0[%c1] : memref<4xf32, #tpu.memory_space<smem>>
    %c2 = arith.constant 2 : index
    %24 = memref.load %arg0[%c2] : memref<4xf32, #tpu.memory_space<smem>>
    %c3 = arith.constant 3 : index
    %25 = memref.load %arg0[%c3] : memref<4xf32, #tpu.memory_space<smem>>
    %26 = arith.mulf %17, %21 : vector<8x1xf32>
    %27 = vector.broadcast %22 : f32 to vector<8x1xf32>
    %28 = arith.mulf %26, %27 : vector<8x1xf32>
    %29 = vector.broadcast %24 : f32 to vector<8x1xf32>
    %30 = arith.addf %28, %29 : vector<8x1xf32>
    %cst_14 = arith.constant 0.000000e+00 : f32
    %31 = vector.broadcast %cst_14 : f32 to vector<8x1xf32>
    %32 = arith.subf %31, %17 : vector<8x1xf32>
    %33 = arith.mulf %32, %21 : vector<8x1xf32>
    %34 = vector.broadcast %23 : f32 to vector<8x1xf32>
    %35 = arith.mulf %33, %34 : vector<8x1xf32>
    %36 = vector.broadcast %25 : f32 to vector<8x1xf32>
    %37 = arith.addf %35, %36 : vector<8x1xf32>
    %cst_15 = arith.constant 0.000000e+00 : f32
    %38 = vector.broadcast %cst_15 : f32 to vector<8x1xf32>
    %39 = arith.subf %38, %30 : vector<8x1xf32>
    %cst_16 = arith.constant 0.000000e+00 : f32
    %40 = vector.broadcast %cst_16 : f32 to vector<8x1xf32>
    %41 = arith.subf %40, %13 : vector<8x1xf32>
    %42 = tpu.concatenate %37, %14, %39, %41 in 1 : vector<8x1xf32>, vector<8x1xf32>, vector<8x1xf32>, vector<8x1xf32> -> vector<8x4xf32>
    %c0_17 = arith.constant 0 : index
    %c0_18 = arith.constant 0 : index
    %43 = vector.load %arg5[%c0_17, %c0_18] : memref<8x4xf32, #tpu.memory_space<vmem>>, vector<8x4xf32>
    tpu.vector_store %arg5[%c0_17, %c0_18], %42 {strides = array<i32>} : memref<8x4xf32, #tpu.memory_space<vmem>>, vector<8x4xf32>,
    %44 = tpu.concatenate %14, %37, %13, %30 in 1 : vector<8x1xf32>, vector<8x1xf32>, vector<8x1xf32>, vector<8x1xf32> -> vector<8x4xf32>
    %c0_19 = arith.constant 0 : index
    %c0_20 = arith.constant 0 : index
    %45 = vector.load %arg6[%c0_19, %c0_20] : memref<8x4xf32, #tpu.memory_space<vmem>>, vector<8x4xf32>
    tpu.vector_store %arg6[%c0_19, %c0_20], %44 {strides = array<i32>} : memref<8x4xf32, #tpu.memory_space<vmem>>, vector<8x4xf32>,
    return
  }
}

module attributes {stable_mosaic.version = 11 : i64} {
  func.func @diff_kernel(%arg0: i32, %arg1: i32, %arg2: memref<8x4xf32, #tpu.memory_space<vmem>>, %arg3: memref<4x128xf32, #tpu.memory_space<vmem>>, %arg4: memref<8x128xf32, #tpu.memory_space<vmem>>) attributes {dimension_semantics = [#tpu.dimension_semantics<parallel>, #tpu.dimension_semantics<parallel>], iteration_bounds = array<i64: 1, 1>, scalar_prefetch = 0 : i64, scratch_operands = 0 : i64, tpu.core_type = #tpu.core_type<tc>, window_params = [{transform_indices = @transform_0, window_bounds = array<i64: 8, 4>}, {transform_indices = @transform_1, window_bounds = array<i64: 4, 128>}, {transform_indices = @transform_2, window_bounds = array<i64: 8, 128>}]} {
    %c0 = arith.constant 0 : index
    %c0_0 = arith.constant 0 : index
    %0 = vector.load %arg2[%c0, %c0_0] : memref<8x4xf32, #tpu.memory_space<vmem>>, vector<8x4xf32>
    %c0_1 = arith.constant 0 : index
    %c0_2 = arith.constant 0 : index
    %1 = vector.load %arg3[%c0_1, %c0_2] : memref<4x128xf32, #tpu.memory_space<vmem>>, vector<4x128xf32>
    %cst = arith.constant dense<0.000000e+00> : vector<8x128xf32>
    %2 = tpu.matmul %0, %1, %cst {dimension_numbers = #tpu.dot_dimension_numbers<[1], [0], [0], [1], [0, 0, 1, 1], [], []>} : vector<8x4xf32>, vector<4x128xf32>, vector<8x128xf32> -> vector<8x128xf32>
    %c0_3 = arith.constant 0 : index
    %c0_4 = arith.constant 0 : index
    %3 = vector.load %arg4[%c0_3, %c0_4] : memref<8x128xf32, #tpu.memory_space<vmem>>, vector<8x128xf32>
    tpu.vector_store %arg4[%c0_3, %c0_4], %2 {strides = array<i32>} : memref<8x128xf32, #tpu.memory_space<vmem>>, vector<8x128xf32>,
    return
  }
  func.func @transform_0(%arg0: i32, %arg1: i32) -> (i32, i32) {
    %c0_i32 = arith.constant 0 : i32
    %c0_i32_0 = arith.constant 0 : i32
    return %arg0, %c0_i32 : i32, i32
  }
  func.func @transform_1(%arg0: i32, %arg1: i32) -> (i32, i32) {
    %c0_i32 = arith.constant 0 : i32
    %c0_i32_0 = arith.constant 0 : i32
    return %c0_i32, %arg1 : i32, i32
  }
  func.func @transform_2(%arg0: i32, %arg1: i32) -> (i32, i32) {
    %c0_i32 = arith.constant 0 : i32
    return %arg0, %arg1 : i32, i32
  }
}

module attributes {stable_mosaic.version = 11 : i64} {
  func.func @attr_kernel(%arg0: i32, %arg1: memref<8x6xf32, #tpu.memory_space<vmem>>, %arg2: memref<8x1xf32, #tpu.memory_space<vmem>>, %arg3: memref<6x128xf32, #tpu.memory_space<vmem>>, %arg4: memref<8x128xf32, #tpu.memory_space<vmem>>) attributes {dimension_semantics = [#tpu.dimension_semantics<parallel>], iteration_bounds = array<i64: 1>, scalar_prefetch = 0 : i64, scratch_operands = 0 : i64, tpu.core_type = #tpu.core_type<tc>, window_params = [{pipeline_mode = #tpu.pipeline_mode<synchronous>, transform_indices = @transform_0, window_bounds = array<i64: 8, 6>}, {pipeline_mode = #tpu.pipeline_mode<synchronous>, transform_indices = @transform_1, window_bounds = array<i64: 8, 1>}, {transform_indices = @transform_2, window_bounds = array<i64: 6, 128>}, {transform_indices = @transform_3, window_bounds = array<i64: 8, 128>}]} {
    %c0 = arith.constant 0 : index
    %c0_0 = arith.constant 0 : index
    %0 = vector.load %arg1[%c0, %c0_0] : memref<8x6xf32, #tpu.memory_space<vmem>>, vector<8x6xf32>
    %c0_1 = arith.constant 0 : index
    %c0_2 = arith.constant 0 : index
    %1 = vector.load %arg3[%c0_1, %c0_2] : memref<6x128xf32, #tpu.memory_space<vmem>>, vector<6x128xf32>
    %cst = arith.constant dense<0.000000e+00> : vector<8x128xf32>
    %2 = tpu.matmul %0, %1, %cst {dimension_numbers = #tpu.dot_dimension_numbers<[1], [0], [0], [1], [0, 0, 1, 1], [], []>} : vector<8x6xf32>, vector<6x128xf32>, vector<8x128xf32> -> vector<8x128xf32>
    %c0_3 = arith.constant 0 : index
    %c0_4 = arith.constant 0 : index
    %3 = vector.load %arg2[%c0_3, %c0_4] : memref<8x1xf32, #tpu.memory_space<vmem>>, vector<8x1xf32>
    %4 = vector.broadcast %3 : vector<8x1xf32> to vector<8x128xf32>
    %5 = arith.addf %2, %4 : vector<8x128xf32>
    %c0_5 = arith.constant 0 : index
    %c0_6 = arith.constant 0 : index
    %6 = vector.load %arg4[%c0_5, %c0_6] : memref<8x128xf32, #tpu.memory_space<vmem>>, vector<8x128xf32>
    tpu.vector_store %arg4[%c0_5, %c0_6], %5 {strides = array<i32>} : memref<8x128xf32, #tpu.memory_space<vmem>>, vector<8x128xf32>,
    return
  }
  func.func @transform_0(%arg0: i32) -> (i32, i32) {
    %c0_i32 = arith.constant 0 : i32
    %c0_i32_0 = arith.constant 0 : i32
    %c0_i32_1 = arith.constant 0 : i32
    return %c0_i32, %c0_i32_0 : i32, i32
  }
  func.func @transform_1(%arg0: i32) -> (i32, i32) {
    %c0_i32 = arith.constant 0 : i32
    %c0_i32_0 = arith.constant 0 : i32
    %c0_i32_1 = arith.constant 0 : i32
    return %c0_i32, %c0_i32_0 : i32, i32
  }
  func.func @transform_2(%arg0: i32) -> (i32, i32) {
    %c0_i32 = arith.constant 0 : i32
    %c0_i32_0 = arith.constant 0 : i32
    return %c0_i32, %arg0 : i32, i32
  }
  func.func @transform_3(%arg0: i32) -> (i32, i32) {
    %c0_i32 = arith.constant 0 : i32
    %c0_i32_0 = arith.constant 0 : i32
    return %c0_i32, %arg0 : i32, i32
  }
}

</mosaic_0001>

<bundles_post_ra>
// kernel: _device_forward.4
= control target key start
LH: loop header
LB: loop body
LE: loop exit
PB: predicated region body
PF: predicated region fallthrough
CT: control target
= control target key end

     0   :  { %vm18_vm0 = vcmask 1043456   ;;  %v143_v2 = vmov 0.0   ;;  %vm144_vm1 = vmmov 0   ;;  %vm14_vm2 = vcmask 31744   ;;  %s179_s0 = inlined_call_operand.vmem [shape: f32[8,4], index: 0, kind: input, shape index: {}]   ;;  %s180_s1 = inlined_call_operand.vmem [shape: f32[4,128], index: 1, kind: input, shape index: {}]   ;;  %s181_s2 = inlined_call_operand.hbm [shape: f32[8,128], index: 2, kind: output, shape index: {}]  }
   0x1   :  { %v13_v0 = vld [vmem:[%s180_s1] sm:$0xf]  ;;  %111 = vmatprep.subr.mxu0 %v143_v2  ;;  %113 = vmatprep.mubr.msk.f32.mxu0 %vm144_vm1, %v143_v2 }
   0x2   :  { %v12_v1 = vld [vmem:[%s179_s0] sm:$0xff] }
   0x3   :  { %7 = vsyncpa [#allocation3], 0  ;;  %112 = vmatpush3.msk.msra.mxu0 %vm18_vm0, %v13_v0  ;;  %s145_s13 = smov [#allocation2]  }
   0x4   :  { %114 = vmatmul.mubr.msk.f32.vlgmr.msra.gmra.mrb[0].mxu0 %vm14_vm2, %v12_v1  ;;  %s99_s14 = sshll.u32 %s145_s13, 4  ;;  %s100_s14 = int_to_ptr.vmem [resolvable:$true] %s99_s14 }
   0x5   :  { %s119_s1 = scalar_lea.vmem %s100_s14, 128  ;;  %p124_p1 = scmp.lt.s32.totalorder %s100_s14, %s100_s14 }
   0x6   :  { %p120_p0 = scmp.ne.s32.totalorder %s100_s14, %s119_s1  ;;  %p125_p2 = scmp.lt.s32.totalorder %s119_s1, %s119_s1 }
   0x8   :  { %p126_p3 = por %p125_p2, %p124_p1 }
   0xa   :  { %p127_p4 = pnand %p126_p3, %p120_p0 }
  0xd7   :  { %v88_v3 = vpop.f32.mrb[0].mxu0 }
  0xd8   :  { %92 = vst [vmem:[#allocation2] sm:$0xff] %v88_v3  ;;  %v115_v4 = vpop.f32.mrb[1].mxu0 }
  0xd9   :  { %130 = shalt.err (!%p127_p4)
}
  0xda   :  { %s131_s16 = scalar_lea.hbm %s181_s2, 128 }
  0xdb   :  { %p132_p5 = scmp.ne.s32.totalorder %s181_s2, %s131_s16  ;;  %p135_p6 = scmp.lt.u32.totalorder %s131_s16, %s181_s2 }
  0xdd   :  { %p137_p7 = pnand %p135_p6, %p132_p5 }
  0xdf   :  { %140 = shalt.err (!%p137_p7)
}
  0xe0   :  { %102 = dma.vmem_to_hbm [thread:$0]  %s100_s14, 128, %s181_s2, [#allocation3]  }
  0xe1   :  { %141 = dma.done.wait [#allocation3], 128  }
  0xe2   :  { %142 = vsyncadd [#allocation3], 4294967168 }
  0xe3   :  { %106 = vsyncpa [#allocation3], 1 }

// kernel: _device_forward.3
= control target key start
LH: loop header
LB: loop body
LE: loop exit
PB: predicated region body
PF: predicated region fallthrough
CT: control target
= control target key end

     0   :  { %12 = vsyncpa [#allocation3], 0  ;;  %s448_s0 = inlined_call_operand.vmem [shape: f32[4], index: 0, kind: input, shape index: {}]   ;;  %s449_s1 = inlined_call_operand.vmem [shape: f32[8,4], index: 1, kind: input, shape index: {}]   ;;  %s450_s2 = inlined_call_operand.vmem [shape: f32[4,4], index: 2, kind: input, shape index: {}]   ;;  %s451_s3 = inlined_call_operand.vmem [shape: f32[4,4], index: 3, kind: input, shape index: {}]   ;;  %s452_s4 = inlined_call_operand.vmem [shape: f32[4,2], index: 4, kind: input, shape index: {}]   ;;  %s453_s5 = inlined_call_operand.vmem [shape: f32[8,4], index: 5, kind: output, shape index: {0}]   ;;  %s454_s6 = inlined_call_operand.vmem [shape: f32[8,4], index: 6, kind: output, shape index: {1}]  }
   0x1   :  { %s19_s23 = sshll.u32 %s448_s0, 4  ;;  %s20_s23 = int_to_ptr.vmem [resolvable:$true] %s19_s23 }
   0x2   :  { %s362_s24 = scalar_lea.vmem %s20_s23, 16  ;;  %p367_p1 = scmp.lt.s32.totalorder %s20_s23, %s20_s23 }
   0x3   :  { %p363_p0 = scmp.ne.s32.totalorder %s20_s23, %s362_s24  ;;  %p368_p2 = scmp.lt.s32.totalorder %s362_s24, %s362_s24 }
   0x5   :  { %p369_p3 = por %p368_p2, %p367_p1 }
   0x7   :  { %p370_p4 = pnand %p369_p3, %p363_p0 }
   0x9   :  { %373 = shalt.err (!%p370_p4)
}
   0xa   :  { %s376_s25 = smov [#allocation2]  }
   0xb   :  { %22 = dma.vmem_to_smem %s20_s23, 16, %s376_s25, [#allocation3]  }
   0xc   :  { %374 = dma.done.wait [#allocation3], 16  }
   0xd   :  { %375 = vsyncadd [#allocation3], 4294967280 }
   0xe   :  { %34 = sfence }
   0xf   :  { %v36_v0 = vld [vmem:[%s450_s2] sm:$0xf]  ;;  %vm41_vm0 = vcmask 1043456   ;;  %v377_v2 = vmov 0.0   ;;  %vm378_vm1 = vmmov 0   ;;  %vm37_vm2 = vcmask 31744  }
  0x10   :  { %v35_v1 = vld [vmem:[%s449_s1] sm:$0xff]  ;;  %339 = vmatprep.subr.mxu0 %v377_v2  ;;  %341 = vmatprep.mubr.msk.f32.mxu0 %vm378_vm1, %v377_v2  ;;  %s379_s1 = smov 127   ;;  %s380_s2 = smov 2   ;;  %vm297_vm3 = vcmask 7168   ;;  %vm299_vm4 = vcmask 15360   ;;  %vm301_vm5 = vcmask 23552  }
  0x11   :  { %v115_v3 = vld [vmem:[%s451_s3] sm:$0xf]  ;;  %340 = vmatpush3.msk.msra.mxu0 %vm41_vm0, %v36_v0  ;;  %344 = vmatprep.subr.mxu1 %v377_v2  ;;  %s381_s3 = smov 3   ;;  %s330_s9 = sld [smem:[#allocation2 + $0x1]] }
  0x12   :  { %v189_v4 = vld [vmem:[%s452_s4] sm:$0xf]  ;;  %342 = vmatmul.mubr.msk.f32.vlgmr.msra.gmra.mrb[0].mxu0 %vm37_vm2, %v35_v1  ;;  %345 = vmatpush3.msk.msra.mxu1 %vm41_vm0, %v115_v3  ;;  %s276_s4 = sld [smem:[#allocation2]]  ;;  %s332_s10 = sld [smem:[#allocation2 + $0x3]] }
  0x13   :  { %346 = vmatprep.mubr.msk.f32.mxu1 %vm378_vm1, %v377_v2  ;;  %349 = vmatprep.subr.mxu0 %v377_v2  ;;  %s331_s11 = sld [smem:[#allocation2 + $0x2]] }
  0x14   :  { %347 = vmatmul.mubr.msk.f32.vlgmr.msra.gmra.mrb[0].mxu1 %vm37_vm2, %v35_v1  ;;  %350 = vmatpush3.msk.msra.mxu0 %vm41_vm0, %v189_v4 }
  0x15   :  { %351 = vmatprep.mubr.msk.f32.mxu0 %vm378_vm1, %v377_v2 }
  0x16   :  { %352 = vmatmul.mubr.msk.f32.vlgmr.msra.gmra.mrb[2].mxu0 %vm37_vm2, %v35_v1 }
  0x17   :  { %v287_v25 = vstv %s330_s9 }
  0x18   :  { %v281_v24 = vstv %s276_s4  ;;  %v289_v29 = vstv %s332_s10 }
  0x19   :  { %v283_v30 = vstv %s331_s11 }
  0xe5   :  { %v111_v5 = vpop.f32.mrb[0].mxu0 }
  0xe6   :  { %v263_v6 = vmul.f32 %v111_v5, %v35_v1  ;;  %v343_v7 = vpop.f32.mrb[1].mxu0 }
  0xe7   :  { %v185_v8 = vpop.f32.mrb[0].mxu1 }
  0xe8   :  { %v267_v9 = vmul.f32 %v185_v8, %v35_v1  ;;  %v348_v10 = vpop.f32.mrb[1].mxu1  ;;  %v264_v11 = vsel %vm37_vm2, %v263_v6, 0.0 }
  0xe9   :  { %265 = vadd.xlane.f32.xlu0 %v264_v11  ;;  %v259_v12 = vpop.f32.mrb[2].mxu0 }
  0xea   :  { %v268_v13 = vsel %vm37_vm2, %v267_v9, 0.0  ;;  %305 = vrot.lane.b32.xlu1 %v259_v12, %s379_s1  ;;  %v353_v14 = vpop.f32.mrb[3].mxu0  ;;  %v292_v15 = vsub.f32 0.0, %v259_v12 }
  0xed   :  { %269 = vadd.xlane.f32.xlu0 %v268_v13 }
  0xee   :  { %308 = vrot.lane.b32.xlu1 %v259_v12, %s380_s2 }
 0x103   :  { %294 = vrot.lane.b32.xlu0 %v292_v15, %s381_s3 }
 0x15c   :  { %v306_v28 = vpop.permute.xlu1 %305 }
 0x160   :  { %v309_v36 = vpop.permute.xlu1 %308 }
 0x176   :  { %v266_v16 = vpop.xlane.xlu0 %265 }
 0x17a   :  { %v270_v17 = vpop.xlane.xlu0 %269 }
 0x17b   :  { %v271_v18 = vsub.f32 %v266_v16, %v270_v17 }
 0x17d   :  { %v272_v19 = vmul.f32 0.5, %v271_v18 }
 0x17e   :  { %v295_v42 = vpop.permute.xlu0 %294 }
 0x17f   :  { %v273_v20 = vmul.f32 %v272_v19, %v272_v19  ;;  %v285_v22 = vsub.f32 0.0, %v272_v19 }
 0x181   :  { %v274_v21 = vadd.f32 1e-05, %v273_v20 }
 0x183   :  { %360 = vrsqrt.f32 %v274_v21 }
 0x18d   :  { %v361_v23 = vpop.eup %360 }
 0x18e   :  { %v280_v26 = vmul.f32 %v361_v23, %v272_v19  ;;  %v286_v27 = vmul.f32 %v361_v23, %v285_v22 }
 0x190   :  { %v282_v31 = vmul.f32 %v281_v24, %v280_v26  ;;  %v288_v32 = vmul.f32 %v287_v25, %v286_v27 }
 0x192   :  { %v290_v33 = vadd.f32 %v289_v29, %v288_v32  ;;  %v284_v34 = vadd.f32 %v283_v30, %v282_v31 }
 0x194   :  { %v311_v35 = vsel %vm297_vm3, %v306_v28, %v290_v33  ;;  %v291_v37 = vsub.f32 0.0, %v284_v34  ;;  %v298_v38 = vsel %vm297_vm3, %v290_v33, %v259_v12 }
 0x195   :  { %v312_v39 = vsel %vm299_vm4, %v311_v35, %v309_v36 }
 0x196   :  { %v313_v40 = vsel %vm301_vm5, %v312_v39, %v284_v34  ;;  %v300_v41 = vsel %vm299_vm4, %v298_v38, %v291_v37 }
 0x197   :  { %314 = vst.msk [vmem:[%s454_s6] sm:$0xff] %vm37_vm2, %v313_v40  ;;  %v302_v43 = vsel %vm301_vm5, %v300_v41, %v295_v42 }
 0x198   :  { %303 = vst.msk [vmem:[%s453_s5] sm:$0xff] %vm37_vm2, %v302_v43 }
 0x199   :  { %323 = vsyncpa [#allocation3], 1 }

// kernel: _device_forward.5
= control target key start
LH: loop header
LB: loop body
LE: loop exit
PB: predicated region body
PF: predicated region fallthrough
CT: control target
= control target key end

     0   :  { %vm27_vm0 = vcmask 1045504   ;;  %v154_v2 = vmov 0.0   ;;  %vm155_vm1 = vmmov 0   ;;  %vm23_vm2 = vcmask 48128   ;;  %s199_s0 = inlined_call_operand.vmem [shape: f32[8,6], index: 0, kind: input, shape index: {}]   ;;  %s200_s1 = inlined_call_operand.vmem [shape: f32[8,1], index: 1, kind: input, shape index: {}]   ;;  %s201_s2 = inlined_call_operand.vmem [shape: f32[6,128], index: 2, kind: input, shape index: {}]   ;;  %s202_s3 = inlined_call_operand.hbm [shape: f32[8,128], index: 3, kind: output, shape index: {}]  }
   0x1   :  { %v16_v0 = vld [vmem:[%s201_s2] sm:$0x3f]  ;;  %120 = vmatprep.subr.mxu0 %v154_v2  ;;  %122 = vmatprep.mubr.msk.f32.mxu0 %vm155_vm1, %v154_v2 }
   0x2   :  { %v15_v1 = vld [vmem:[%s199_s0] sm:$0xff] }
   0x3   :  { %v17_v3 = vld [vmem:[%s200_s1] sm:$0xff] }
   0x4   :  { %8 = vsyncpa [#allocation3], 0  ;;  %121 = vmatpush3.msk.msra.mxu0 %vm27_vm0, %v16_v0  ;;  %v156_v4 = vmov 0   ;;  %s157_s2 = smov [#allocation2]  }
   0x5   :  { %129 = vset.pattern.permute.xlu0 %v156_v4  ;;  %123 = vmatmul.mubr.msk.f32.vlgmr.msra.gmra.mrb[0].mxu0 %vm23_vm2, %v15_v1  ;;  %s108_s18 = sshll.u32 %s157_s2, 4  ;;  %s109_s18 = int_to_ptr.vmem [resolvable:$true] %s108_s18 }
   0x6   :  { %20 = vperm.xlu0 %129, %v17_v3   ;;  %s130_s0 = scalar_lea.vmem %s109_s18, 128  ;;  %p135_p1 = scmp.lt.s32.totalorder %s109_s18, %s109_s18 }
   0x7   :  { %p131_p0 = scmp.ne.s32.totalorder %s109_s18, %s130_s0  ;;  %p136_p2 = scmp.lt.s32.totalorder %s130_s0, %s130_s0 }
   0x9   :  { %p137_p3 = por %p136_p2, %p135_p1 }
   0xb   :  { %p138_p4 = pnand %p137_p3, %p131_p0 }
  0x85   :  { %v21_v5 = vpop.permute.xlu0 %20 }
  0xd8   :  { %v97_v6 = vpop.f32.mrb[0].mxu0 }
  0xd9   :  { %v98_v7 = vadd.f32 %v97_v6, %v21_v5  ;;  %v124_v8 = vpop.f32.mrb[1].mxu0 }
  0xdb   :  { %101 = vst [vmem:[#allocation2] sm:$0xff] %v98_v7 }
  0xdc   :  { %141 = shalt.err (!%p138_p4)
}
  0xdd   :  { %s142_s20 = scalar_lea.hbm %s202_s3, 128 }
  0xde   :  { %p143_p5 = scmp.ne.s32.totalorder %s202_s3, %s142_s20  ;;  %p146_p6 = scmp.lt.u32.totalorder %s142_s20, %s202_s3 }
  0xe0   :  { %p148_p7 = pnand %p146_p6, %p143_p5 }
  0xe2   :  { %151 = shalt.err (!%p148_p7)
}
  0xe3   :  { %111 = dma.vmem_to_hbm [thread:$0]  %s109_s18, 128, %s202_s3, [#allocation3]  }
  0xe4   :  { %152 = dma.done.wait [#allocation3], 128  }
  0xe5   :  { %153 = vsyncadd [#allocation3], 4294967168 }
  0xe6   :  { %115 = vsyncpa [#allocation3], 1 }

</bundles_post_ra>
